<compile_context>
chip_gen: v7x
topology: tpu7x:2x2x1
jax: 0.10.0
libtpu: 0.0.40
codegen_flags: <defaults>
</compile_context>

<pallas_src>
import math

import jax
import jax.numpy as jnp
from jax.experimental import pallas as pl
from jax.experimental.pallas import tpu as pltpu


def _round_up(x: int, m: int) -> int:
    return ((x + m - 1) // m) * m


def _lane_pack_factor(f_in: int, f_out: int, max_pack: int = 8) -> int:
    """Pack factor r so that both r*f_in and r*f_out are multiples of 128
    (lane-dense loads AND unmasked 128-lane stores)."""
    def need(f: int) -> int:
        return 128 // math.gcd(128, f)

    r_in, r_out = need(f_in), need(f_out)
    r = r_in * r_out // math.gcd(r_in, r_out)  # lcm
    if r <= max_pack:
        return r
    if r_out <= max_pack:
        return r_out  # at least keep the output stores lane-dense
    # TODO(synk): general lane packing for feature sizes that don't divide 128.
    return 1


def prepare_time_distributed_linear_params(weight, bias, lane_pack: int,
                                            dtype=None):
    """Build the pre-transposed, lane-packed weight/bias ONCE (outside the
    per-call hot path).

    weight : (F_out, F_in) torch nn.Linear layout
    bias   : (F_out,)
    returns (w_packed (r*F_in, r*F_out), b_packed (1, r*F_out))
    """
    f_out, f_in = weight.shape
    r = lane_pack
    if dtype is None:
        dtype = weight.dtype
    w_t = weight.T.astype(dtype)           # one-time transpose, not per call
    b = bias.astype(dtype)
    if r == 1:
        return w_t, b.reshape(1, f_out)
    # Block-diagonal replication: one slab row holding r packed input rows
    # produces r packed output rows -> 128-lane-dense K and N.
    w_big = jnp.zeros((r * f_in, r * f_out), dtype=dtype)
    for j in range(r):
        w_big = w_big.at[j * f_in:(j + 1) * f_in,
                         j * f_out:(j + 1) * f_out].set(w_t)
    b_big = jnp.tile(b.reshape(1, f_out), (1, r))
    return w_big, b_big


def _linear_kernel(x_ref, w_ref, b_ref, o_ref):
    # One row tile per grid step: MXU matmul with f32 accumulation + bias.
    acc = jnp.dot(x_ref[...], w_ref[...], preferred_element_type=jnp.float32)
    o_ref[...] = (acc + b_ref[...].astype(jnp.float32)).astype(o_ref.dtype)


def time_distributed_linear(x, w_packed, b_packed, out_features: int,
                            lane_pack: int = 1, tile_rows: int = 8192,
                            core_parallel: bool = False):
    """Equivalent of TimeDistributed(nn.Linear(F_in, F_out))(x).

    x        : (B, T, F_in)
    w_packed : (r*F_in, r*F_out)  from prepare_time_distributed_linear_params
    b_packed : (1, r*F_out)
    returns  : (B, T, F_out)  in x.dtype
    """
    B, T, F_in = x.shape
    r = lane_pack
    Kp = r * F_in
    Np = r * out_features
    assert w_packed.shape == (Kp, Np)
    assert b_packed.shape == (1, Np)

    # __multi_time: fold time into batch (pure reshape glue, free).
    M = B * T
    x_flat = x.reshape(M, F_in)

    # Pack r consecutive rows into one lane-dense slab row (free row-major
    # reshape).  Only a ragged M (B*T not a multiple of r) pays a pad copy.
    M_r = _round_up(M, r)
    if M_r != M:
        # TODO(synk): dedicated tail block to avoid this pad copy for ragged B*T.
        x_flat = jnp.pad(x_flat, ((0, M_r - M), (0, 0)))
    M_slab = M_r // r
    x_slab = x_flat.reshape(M_slab, Kp)

    # Optional reduced-precision input stream (weights prepared in bf16).
    if x_slab.dtype != w_packed.dtype:
        x_slab = x_slab.astype(w_packed.dtype)

    # Row-tile sizing: multiple of 8 (sublane rule); if the whole problem fits
    # in one tile, use the exact array extent (block dim == array dim is legal).
    tile = _round_up(tile_rows, 8)
    if M_slab <= tile:
        tile = M_slab
    grid = (pl.cdiv(M_slab, tile),)  # ragged last block handled by Pallas

    sem = pltpu.CORE_PARALLEL if core_parallel else pltpu.PARALLEL

    itemsize = x.dtype.itemsize
    cost = pl.CostEstimate(
        flops=2 * M * F_in * out_features,            # useful FLOPs, not r-inflated
        transcendentals=0,
        bytes_accessed=(M * (F_in + out_features)) * itemsize
        + w_packed.size * w_packed.dtype.itemsize
        + b_packed.size * b_packed.dtype.itemsize)

    y_slab = pl.pallas_call(
        _linear_kernel,
        out_shape=jax.ShapeDtypeStruct((M_slab, Np), x.dtype),
        grid=grid,
        in_specs=[
            # Streamed row tiles (double-buffered by default).
            pl.BlockSpec((tile, Kp), lambda i: (i, 0)),
            # Grid-invariant weight/bias: resident, single-buffered.
            pl.BlockSpec((Kp, Np), lambda i: (0, 0),
                         pipeline_mode=pl.Buffered(1)),
            pl.BlockSpec((1, Np), lambda i: (0, 0),
                         pipeline_mode=pl.Buffered(1)),
        ],
        out_specs=pl.BlockSpec((tile, Np), lambda i: (i, 0)),
        compiler_params=pltpu.CompilerParams(
            dimension_semantics=(sem,),
            vmem_limit_bytes=48 * 1024 * 1024,
        ),
        cost_estimate=cost,
    )(x_slab, w_packed, b_packed)

    # Unpack slab -> flat rows (free reshape), drop the (rare) r-pad rows.
    y_flat = y_slab.reshape(M_r, out_features)
    if M_r != M:
        y_flat = y_flat[:M]

    # __dist_time: restore (batch, time) leading dims.
    return y_flat.reshape(B, T, out_features)


if __name__ == "__main__":
    B, T, F_in, F_out = 2, 8, 32, 64

    key = jax.random.PRNGKey(0)
    kx, kw, kb = jax.random.split(key, 3)
    x = jax.random.normal(kx, (B, T, F_in), dtype=jnp.float32)
    # Deterministic synthetic Linear parameters (torch layout: (out, in)).
    weight = jax.random.normal(kw, (F_out, F_in), dtype=jnp.float32) * 0.1
    bias = jax.random.normal(kb, (F_out,), dtype=jnp.float32) * 0.1

    # One-time parameter packing (outside the per-call hot path).
    r = _lane_pack_factor(F_in, F_out)                 # 4 -> Kp=128, Np=256
    w_packed, b_packed = prepare_time_distributed_linear_params(weight, bias, r)
    w_packed = jax.block_until_ready(w_packed)

    # On v7x pass core_parallel=True to split row tiles across the 2 TCs.
    y = time_distributed_linear(x, w_packed, b_packed, F_out, lane_pack=r)
    y = jax.block_until_ready(y)

    # Reference check against plain JAX.
    y_ref = (x.reshape(B * T, F_in) @ weight.T + bias).reshape(B, T, F_out)
    assert y.shape == (B, T, F_out)
    assert jnp.allclose(y, y_ref, atol=1e-4, rtol=1e-4)

    print("KERNEL_OK")
</pallas_src>

<mosaic_0001>
module attributes {stable_mosaic.version = 11 : i64} {
  func.func @_linear_kernel(%arg0: i32, %arg1: memref<4x128xf32, #tpu.memory_space<vmem>>, %arg2: memref<128x256xf32, #tpu.memory_space<vmem>>, %arg3: memref<1x256xf32, #tpu.memory_space<vmem>>, %arg4: memref<4x256xf32, #tpu.memory_space<vmem>>) attributes {dimension_semantics = [#tpu.dimension_semantics<parallel>], iteration_bounds = array<i64: 1>, scalar_prefetch = 0 : i64, scratch_operands = 0 : i64, tpu.core_type = #tpu.core_type<tc>, window_params = [{transform_indices = @transform_0, window_bounds = array<i64: 4, 128>}, {pipeline_mode = #tpu.pipeline_mode<synchronous>, transform_indices = @transform_1, window_bounds = array<i64: 128, 256>}, {pipeline_mode = #tpu.pipeline_mode<synchronous>, transform_indices = @transform_2, window_bounds = array<i64: 1, 256>}, {transform_indices = @transform_3, window_bounds = array<i64: 4, 256>}]} {
    %c0 = arith.constant 0 : index
    %c0_0 = arith.constant 0 : index
    %0 = vector.load %arg1[%c0, %c0_0] : memref<4x128xf32, #tpu.memory_space<vmem>>, vector<4x128xf32>
    %c0_1 = arith.constant 0 : index
    %c0_2 = arith.constant 0 : index
    %1 = vector.load %arg2[%c0_1, %c0_2] : memref<128x256xf32, #tpu.memory_space<vmem>>, vector<128x256xf32>
    %cst = arith.constant dense<0.000000e+00> : vector<4x256xf32>
    %2 = tpu.matmul %0, %1, %cst {dimension_numbers = #tpu.dot_dimension_numbers<[1], [0], [0], [1], [0, 0, 1, 1], [], []>} : vector<4x128xf32>, vector<128x256xf32>, vector<4x256xf32> -> vector<4x256xf32>
    %c0_3 = arith.constant 0 : index
    %c0_4 = arith.constant 0 : index
    %3 = vector.load %arg3[%c0_3, %c0_4] : memref<1x256xf32, #tpu.memory_space<vmem>>, vector<1x256xf32>
    %4 = vector.broadcast %3 : vector<1x256xf32> to vector<4x256xf32>
    %5 = arith.addf %2, %4 : vector<4x256xf32>
    %c0_5 = arith.constant 0 : index
    %c0_6 = arith.constant 0 : index
    %6 = vector.load %arg4[%c0_5, %c0_6] : memref<4x256xf32, #tpu.memory_space<vmem>>, vector<4x256xf32>
    tpu.vector_store %arg4[%c0_5, %c0_6], %5 {strides = array<i32>} : memref<4x256xf32, #tpu.memory_space<vmem>>, vector<4x256xf32>,
    return
  }
  func.func @transform_0(%arg0: i32) -> (i32, i32) {
    %c0_i32 = arith.constant 0 : i32
    %c0_i32_0 = arith.constant 0 : i32
    return %arg0, %c0_i32 : i32, i32
  }
  func.func @transform_1(%arg0: i32) -> (i32, i32) {
    %c0_i32 = arith.constant 0 : i32
    %c0_i32_0 = arith.constant 0 : i32
    %c0_i32_1 = arith.constant 0 : i32
    return %c0_i32, %c0_i32_0 : i32, i32
  }
  func.func @transform_2(%arg0: i32) -> (i32, i32) {
    %c0_i32 = arith.constant 0 : i32
    %c0_i32_0 = arith.constant 0 : i32
    %c0_i32_1 = arith.constant 0 : i32
    return %c0_i32, %c0_i32_0 : i32, i32
  }
  func.func @transform_3(%arg0: i32) -> (i32, i32) {
    %c0_i32 = arith.constant 0 : i32
    %c0_i32_0 = arith.constant 0 : i32
    return %arg0, %c0_i32 : i32, i32
  }
}

</mosaic_0001>

<bundles_post_ra>
// kernel: tpu_custom_call.1
= control target key start
LH: loop header
LB: loop body
LE: loop exit
PB: predicated region body
PF: predicated region fallthrough
CT: control target
= control target key end

     0   :  { %8 = vsyncpa [#allocation3], 0  ;;  %s360_s0 = inlined_call_operand.hbm [shape: f32[4,128], index: 0, kind: input, shape index: {}]   ;;  %s361_s1 = inlined_call_operand.hbm [shape: f32[128,256], index: 1, kind: input, shape index: {}]   ;;  %s362_s2 = inlined_call_operand.vmem [shape: f32[1,256], index: 2, kind: input, shape index: {}]   ;;  %s363_s3 = inlined_call_operand.hbm [shape: f32[4,256], index: 3, kind: output, shape index: {}]  }
   0x1   :  { %9 = vsyncpa [#allocation6], 0 }
   0x2   :  { %10 = vsyncpa [#allocation4], 0  ;;  %s288_s12 = smov [#allocation2]   ;;  %s289_s14 = smov [#allocation5]  }
   0x3   :  { %s17_s13 = sshll.u32 %s288_s12, 4  ;;  %s26_s15 = sshll.u32 %s289_s14, 4  ;;  %s18_s13 = int_to_ptr.vmem [resolvable:$true] %s17_s13  ;;  %s314_s15 = int_to_ptr.vmem [resolvable:$true] %s26_s15 }
   0x4   :  { %s216_s18 = scalar_lea.hbm %s360_s0, 64 }
   0x5   :  { %p217_p0 = scmp.ne.s32.totalorder %s360_s0, %s216_s18  ;;  %p220_p1 = scmp.lt.u32.totalorder %s216_s18, %s360_s0 }
   0x7   :  { %p222_p2 = pnand %p220_p1, %p217_p0 }
   0x9   :  { %225 = shalt.err (!%p222_p2)
}
   0xa   :  { %s226_s23 = scalar_lea.vmem %s18_s13, 64  ;;  %p231_p4 = scmp.lt.s32.totalorder %s18_s13, %s18_s13 }
   0xb   :  { %p227_p3 = scmp.ne.s32.totalorder %s18_s13, %s226_s23  ;;  %p232_p5 = scmp.lt.s32.totalorder %s226_s23, %s226_s23 }
   0xd   :  { %p233_p6 = por %p232_p5, %p231_p4 }
   0xf   :  { %p234_p7 = pnand %p233_p6, %p227_p3 }
  0x11   :  { %237 = shalt.err (!%p234_p7)
}
  0x12   :  { %20 = dma.hbm_to_vmem [thread:$0]  %s360_s0, 64, %s18_s13, [#allocation3]  }
  0x13   :  { %s238_s28 = scalar_lea.hbm %s361_s1, 4096 }
  0x14   :  { %p239_p8 = scmp.ne.s32.totalorder %s361_s1, %s238_s28  ;;  %p242_p9 = scmp.lt.u32.totalorder %s238_s28, %s361_s1 }
  0x16   :  { %p244_p10 = pnand %p242_p9, %p239_p8 }
  0x18   :  { %247 = shalt.err (!%p244_p10)
}
  0x19   :  { %s248_s6 = scalar_lea.vmem %s314_s15, 4096  ;;  %p253_p12 = scmp.lt.s32.totalorder %s314_s15, %s314_s15 }
  0x1a   :  { %p249_p11 = scmp.ne.s32.totalorder %s314_s15, %s248_s6  ;;  %p254_p13 = scmp.lt.s32.totalorder %s248_s6, %s248_s6 }
  0x1c   :  { %p255_p0 = por %p254_p13, %p253_p12 }
  0x1e   :  { %p256_p1 = pnand %p255_p0, %p249_p11 }
  0x20   :  { %259 = shalt.err (!%p256_p1)
}
  0x21   :  { %s290_s0 = smov 256   ;;  %s291_s7 = smov 16  }
  0x22   :  { %32 = dma.hbm_to_vmem [thread:$0]  %s361_s1, 4096, %s314_s15, [#allocation6], %s290_s0, %s290_s0, %s291_s7  }
  0x23   :  { %282 = dma.done.wait [#allocation3], 64  }
  0x24   :  { %283 = vsyncadd [#allocation3], 4294967232 }
  0x25   :  { %284 = dma.done.wait [#allocation6], 4096  }
  0x26   :  { %285 = vsyncadd [#allocation6], 4294963200  ;;  %v292_v0 = vmov 0.0   ;;  %v43_v1 = vld [vmem:[#allocation5 + $0x8] sm:$0xff]  ;;  %v45_v2 = vld [vmem:[#allocation5 + $0x18] sm:$0xff]  ;;  %v76_v50 = vlaneseq  ;;  %s293_s11 = smov [#allocation7]  }
  0x27   :  { %150 = vmatprep.mubr.f32.mxu0 %v292_v0  ;;  %v42_v3 = vld [vmem:[#allocation5] sm:$0xff]  ;;  %v178_v4 = vpack.c.bf16 %v45_v2, %v43_v1  ;;  %v44_v5 = vld [vmem:[#allocation5 + $0x10] sm:$0xff]  ;;  %v47_v6 = vld [vmem:[#allocation5 + $0x28] sm:$0xff]  ;;  %s168_s12 = sshll.u32 %s293_s11, 4  ;;  %s169_s12 = int_to_ptr.vmem [resolvable:$true] %s168_s12 }
  0x28   :  { %v49_v7 = vld [vmem:[#allocation5 + $0x38] sm:$0xff]  ;;  %v180_v8 = vpack.c.bf16 %v44_v5, %v42_v3  ;;  %v46_v10 = vld [vmem:[#allocation5 + $0x20] sm:$0xff]  ;;  %v48_v11 = vld [vmem:[#allocation5 + $0x30] sm:$0xff]  ;;  %v77_v51 = vshrl.u32 %v76_v50, 7  ;;  %s260_s13 = scalar_lea.vmem %s169_s12, 128  ;;  %p265_p3 = scmp.lt.s32.totalorder %s169_s12, %s169_s12 }
  0x29   :  { %v182_v9 = vpack.c.bf16 %v49_v7, %v47_v6  ;;  %v51_v12 = vld [vmem:[#allocation5 + $0x48] sm:$0xff]  ;;  %179 = vmatprep.subr.bf16.mxu0 %v178_v4  ;;  %v53_v13 = vld [vmem:[#allocation5 + $0x58] sm:$0xff]  ;;  %v184_v14 = vpack.c.bf16 %v48_v11, %v46_v10  ;;  %v50_v16 = vld [vmem:[#allocation5 + $0x40] sm:$0xff]  ;;  %p261_p2 = scmp.ne.s32.totalorder %s169_s12, %s260_s13  ;;  %p266_p4 = scmp.lt.s32.totalorder %s260_s13, %s260_s13 }
  0x2a   :  { %181 = vmatpush1.bf16.msra.mxu0 %v180_v8  ;;  %v186_v15 = vpack.c.bf16 %v53_v13, %v51_v12  ;;  %v52_v17 = vld [vmem:[#allocation5 + $0x50] sm:$0xff]  ;;  %v55_v18 = vld [vmem:[#allocation5 + $0x68] sm:$0xff]  ;;  %v57_v19 = vld [vmem:[#allocation5 + $0x78] sm:$0xff]  ;;  %v78_v52 = vsub.s32 0, %v77_v51  ;;  %v82_v54 = vsub.s32 1, %v77_v51 }
  0x2b   :  { %183 = vmatprep.subr.bf16.mxu0 %v182_v9  ;;  %v188_v20 = vpack.c.bf16 %v52_v17, %v50_v16  ;;  %v190_v21 = vpack.c.bf16 %v57_v19, %v55_v18  ;;  %v54_v22 = vld [vmem:[#allocation5 + $0x60] sm:$0xff]  ;;  %v56_v23 = vld [vmem:[#allocation5 + $0x70] sm:$0xff]  ;;  %v59_v24 = vld [vmem:[#allocation5 + $0x88] sm:$0xff]  ;;  %p267_p5 = por %p266_p4, %p265_p3 }
  0x2c   :  { %v61_v25 = vld [vmem:[#allocation5 + $0x98] sm:$0xff]  ;;  %v192_v26 = vpack.c.bf16 %v56_v23, %v54_v22  ;;  %v58_v28 = vld [vmem:[#allocation5 + $0x80] sm:$0xff]  ;;  %v60_v29 = vld [vmem:[#allocation5 + $0x90] sm:$0xff] }
  0x2d   :  { %v194_v27 = vpack.c.bf16 %v61_v25, %v59_v24  ;;  %v63_v30 = vld [vmem:[#allocation5 + $0xa8] sm:$0xff]  ;;  %v65_v31 = vld [vmem:[#allocation5 + $0xb8] sm:$0xff]  ;;  %v196_v32 = vpack.c.bf16 %v60_v29, %v58_v28  ;;  %v62_v34 = vld [vmem:[#allocation5 + $0xa0] sm:$0xff]  ;;  %p268_p6 = pnand %p267_p5, %p261_p2 }
  0x2e   :  { %185 = vmatpush1.bf16.msra.mxu0 %v184_v14  ;;  %v198_v33 = vpack.c.bf16 %v65_v31, %v63_v30  ;;  %v64_v35 = vld [vmem:[#allocation5 + $0xb0] sm:$0xff]  ;;  %v67_v36 = vld [vmem:[#allocation5 + $0xc8] sm:$0xff]  ;;  %v69_v37 = vld [vmem:[#allocation5 + $0xd8] sm:$0xff] }
  0x2f   :  { %187 = vmatprep.subr.bf16.mxu0 %v186_v15  ;;  %v200_v38 = vpack.c.bf16 %v64_v35, %v62_v34  ;;  %v202_v39 = vpack.c.bf16 %v69_v37, %v67_v36  ;;  %v66_v40 = vld [vmem:[#allocation5 + $0xc0] sm:$0xff]  ;;  %v68_v41 = vld [vmem:[#allocation5 + $0xd0] sm:$0xff]  ;;  %v71_v42 = vld [vmem:[#allocation5 + $0xe8] sm:$0xff] }
  0x30   :  { %v73_v43 = vld [vmem:[#allocation5 + $0xf8] sm:$0xff]  ;;  %v204_v44 = vpack.c.bf16 %v68_v41, %v66_v40  ;;  %v70_v46 = vld [vmem:[#allocation5 + $0xe0] sm:$0xff]  ;;  %v72_v47 = vld [vmem:[#allocation5 + $0xf0] sm:$0xff] }
  0x31   :  { %v206_v45 = vpack.c.bf16 %v73_v43, %v71_v42  ;;  %v208_v48 = vpack.c.bf16 %v72_v47, %v70_v46  ;;  %v41_v49 = vld [vmem:[#allocation2] sm:$0xf] }
  0x32   :  { %189 = vmatpush1.bf16.msra.mxu0 %v188_v20  ;;  %v74_v53 = vld [vmem:[%s362_s2] sm:$0x3] }
  0x33   :  { %191 = vmatprep.subr.bf16.mxu0 %v190_v21  ;;  %v79_v55 = vrot.slane %v74_v53, %v78_v52  ;;  %v83_v56 = vrot.slane %v74_v53, %v82_v54 }
  0x36   :  { %193 = vmatpush1.bf16.msra.mxu0 %v192_v26 }
  0x37   :  { %195 = vmatprep.subr.bf16.mxu0 %v194_v27 }
  0x3a   :  { %197 = vmatpush1.bf16.msra.mxu0 %v196_v32 }
  0x3b   :  { %199 = vmatprep.subr.bf16.mxu0 %v198_v33 }
  0x3e   :  { %201 = vmatpush1.bf16.msra.mxu0 %v200_v38 }
  0x3f   :  { %203 = vmatprep.subr.bf16.mxu0 %v202_v39 }
  0x42   :  { %205 = vmatpush1.bf16.msra.mxu0 %v204_v44 }
  0x43   :  { %207 = vmatprep.subr.bf16.mxu0 %v206_v45 }
  0x46   :  { %209 = vmatpush1.bf16.msra.mxu0 %v208_v48 }
  0x49   :  { %151 = vmatmul.mubr.f32.vlgmr.msra.gmra.mrb[0].mxu0 %v41_v49 }
 0x11c   :  { %v152_v57 = vpop.f32.mrb[0].mxu0 }
 0x11d   :  { %v153_v58 = vadd.f32 %v152_v57, %v79_v55  ;;  %v154_v59 = vpop.f32.mrb[1].mxu0 }
 0x11e   :  { %v155_v60 = vadd.f32 %v154_v59, %v83_v56 }
 0x120   :  { %v159_v61 = vcombine.low %v153_v58, %v155_v60 }
 0x122   :  { %161 = vst [vmem:[#allocation7] sm:$0xff] %v159_v61 }
 0x123   :  { %271 = shalt.err (!%p268_p6)
}
 0x124   :  { %s272_s15 = scalar_lea.hbm %s363_s3, 128 }
 0x125   :  { %p273_p7 = scmp.ne.s32.totalorder %s363_s3, %s272_s15  ;;  %p276_p8 = scmp.lt.u32.totalorder %s272_s15, %s363_s3 }
 0x127   :  { %p278_p9 = pnand %p276_p8, %p273_p7 }
 0x129   :  { %281 = shalt.err (!%p278_p9)
}
 0x12a   :  { %171 = dma.vmem_to_hbm [thread:$0]  %s169_s12, 128, %s363_s3, [#allocation4]  }
 0x12b   :  { %286 = dma.done.wait [#allocation4], 128  }
 0x12c   :  { %287 = vsyncadd [#allocation4], 4294967168 }
 0x12d   :  { %175 = vsyncpa [#allocation3], 1 }
 0x12e   :  { %176 = vsyncpa [#allocation6], 1 }
 0x12f   :  { %177 = vsyncpa [#allocation4], 1 }

</bundles_post_ra>
